<compile_context>
chip_gen: v7x
topology: tpu7x:2x2x1
jax: 0.10.0
libtpu: 0.0.40
codegen_flags: <defaults>
</compile_context>

<pallas_src>
import functools

import jax
import jax.numpy as jnp
from jax.experimental import pallas as pl
from jax.experimental.pallas import tpu as pltpu


# ----------------------------------------------------------------------------
# Shared math (used inside the Pallas kernel and by the pure-JAX reference)
# ----------------------------------------------------------------------------
def _layer_norm(x, gamma, beta, eps=1e-5):
    mu = jnp.mean(x, axis=-1, keepdims=True)
    var = jnp.mean((x - mu) ** 2, axis=-1, keepdims=True)
    return (x - mu) * jax.lax.rsqrt(var + eps) * gamma + beta


def _softmax(x):
    m = jnp.max(x, axis=-1, keepdims=True)
    e = jnp.exp(x - m)
    return e / jnp.sum(e, axis=-1, keepdims=True)


def _self_attention_block(x, key_invalid, npm, params, *, n_head, d_k, d_v):
    """SelfAttention forward for one block of batch elements.

    x:           (Bb, L, d_model) f32
    key_invalid: (Bb, 1, L) f32, 1.0 => padded key (masked)
    npm:         (Bb, L, 1) f32 non-pad mask (1.0 => valid token)
    Weights are bf16 (1/sqrt(d_k) already folded into wq/bq); biases/LN params f32.
    """
    (wq, bq, wk, bk, wv, bv, wfc, bfc, g1, be1,
     w1, b1, w2, b2, g2, be2) = params
    Bb, L, dm = x.shape
    bf16 = jnp.bfloat16

    residual = x.reshape(Bb * L, dm)                      # f32 residual
    xb = residual.astype(bf16)

    # --- fused full-width Q/K/V projections (MXU-friendly N = n_head*d_k) ---
    q_all = jnp.dot(xb, wq, preferred_element_type=jnp.float32) + bq   # (Bb*L, H*dk), scaled
    k_all = jnp.dot(xb, wk, preferred_element_type=jnp.float32) + bk
    v_all = jnp.dot(xb, wv, preferred_element_type=jnp.float32) + bv

    q3 = q_all.reshape(Bb, L, n_head * d_k)
    k3 = k_all.reshape(Bb, L, n_head * d_k)
    v3 = v_all.reshape(Bb, L, n_head * d_v)

    # split heads onto the leading (matmul-batch) axis: G = n_head*Bb, ordered (head, batch)
    qh = jnp.concatenate([q3[:, :, h * d_k:(h + 1) * d_k] for h in range(n_head)], axis=0)
    kh = jnp.concatenate([k3[:, :, h * d_k:(h + 1) * d_k] for h in range(n_head)], axis=0)
    vh = jnp.concatenate([v3[:, :, h * d_v:(h + 1) * d_v] for h in range(n_head)], axis=0)

    # --- scaled dot-product attention (scale folded into wq/bq) ---
    scores = jnp.einsum("gqd,gkd->gqk", qh.astype(bf16), kh.astype(bf16),
                        preferred_element_type=jnp.float32)            # (G, L, L)
    mask_g = jnp.concatenate([key_invalid] * n_head, axis=0)           # (G, 1, L)
    scores = jnp.where(mask_g > 0.0, jnp.float32(-1e9), scores)        # finite fill: no NaNs
    attn = _softmax(scores)                                            # attn dropout: identity
    o = jnp.einsum("gqk,gkd->gqd", attn.astype(bf16), vh.astype(bf16),
                   preferred_element_type=jnp.float32)                 # (G, L, d_v)

    # --- fused output projection over concatenated heads ---
    o_cat = jnp.concatenate([o[h * Bb:(h + 1) * Bb] for h in range(n_head)], axis=-1)
    o_flat = o_cat.reshape(Bb * L, n_head * d_v)
    attn_out = jnp.dot(o_flat.astype(bf16), wfc,
                       preferred_element_type=jnp.float32) + bfc       # (Bb*L, dm)
    x1 = _layer_norm(attn_out + residual, g1, be1)                     # fc dropout: identity
    x1 = x1.reshape(Bb, L, dm) * npm                                   # enc_output *= non_pad_mask

    # --- position-wise FFN (1x1 Conv1d == per-token Linear) ---
    xf1 = x1.reshape(Bb * L, dm)
    h1 = jnp.maximum(jnp.dot(xf1.astype(bf16), w1,
                             preferred_element_type=jnp.float32) + b1, 0.0)
    y = jnp.dot(h1.astype(bf16), w2, preferred_element_type=jnp.float32) + b2
    y = _layer_norm(y + xf1, g2, be2).reshape(Bb, L, dm)               # dropout: identity
    return y * npm                                                     # enc_output *= non_pad_mask


# ----------------------------------------------------------------------------
# Pallas kernel: one grid step = one block of `block_b` batch elements in VMEM.
# ----------------------------------------------------------------------------
def self_attention_kernel(lens_ref, x_ref, *rest, n_head, d_k, d_v, block_b, seq_len):
    param_refs = rest[:-1]
    out_ref = rest[-1]
    params = tuple(r[...] for r in param_refs)

    x = x_ref[...].astype(jnp.float32)                    # (Bb, L, dm)

    # rebuild pad masks from scalar-prefetched lengths (no dense (L, L) f32 mask DMA)
    b0 = pl.program_id(0) * block_b
    key_idx = jax.lax.broadcasted_iota(jnp.int32, (1, 1, seq_len), 2)
    q_idx = jax.lax.broadcasted_iota(jnp.int32, (1, seq_len, 1), 1)
    key_inv_rows = []
    npm_rows = []
    for i in range(block_b):                              # block_b is small & static
        ln = lens_ref[b0 + i]
        key_inv_rows.append((key_idx >= ln).astype(jnp.float32))   # (1, 1, L)
        npm_rows.append((q_idx < ln).astype(jnp.float32))          # (1, L, 1)
    key_invalid = jnp.concatenate(key_inv_rows, axis=0)   # (Bb, 1, L)
    npm = jnp.concatenate(npm_rows, axis=0)               # (Bb, L, 1)

    y = _self_attention_block(x, key_invalid, npm, params,
                              n_head=n_head, d_k=d_k, d_v=d_v)
    out_ref[...] = y.astype(out_ref.dtype)


def _const_spec(arr):
    zeros = (0,) * arr.ndim
    return pl.BlockSpec(arr.shape, lambda b, lens, _z=zeros: _z)


def _pick_block_b(B, L):
    """Largest divisor of B such that block_b*L ~ fills the MXU M dimension."""
    target = max(1, 128 // max(L, 1))
    bb = 1
    for c in range(1, min(B, target) + 1):
        if B % c == 0:
            bb = c
    return bb


def self_attention_forward(x, lengths, params, *, n_head, d_k, d_v, block_b=None):
    B, L, dm = x.shape
    if block_b is None:
        block_b = _pick_block_b(B, L)
    assert B % block_b == 0

    kernel = functools.partial(self_attention_kernel, n_head=n_head, d_k=d_k, d_v=d_v,
                               block_b=block_b, seq_len=L)

    grid_spec = pltpu.PrefetchScalarGridSpec(
        num_scalar_prefetch=1,                                   # lengths -> SMEM
        grid=(B // block_b,),
        in_specs=[pl.BlockSpec((block_b, L, dm), lambda b, lens: (b, 0, 0))]
                 + [_const_spec(p) for p in params],
        out_specs=pl.BlockSpec((block_b, L, dm), lambda b, lens: (b, 0, 0)),
    )

    return pl.pallas_call(
        kernel,
        out_shape=jax.ShapeDtypeStruct((B, L, dm), x.dtype),
        grid_spec=grid_spec,
        compiler_params=pltpu.CompilerParams(
            dimension_semantics=("parallel",),                   # shard batch across v7x TCs
            vmem_limit_bytes=48 * 1024 * 1024),
    )(lengths.astype(jnp.int32), x, *params)


# ----------------------------------------------------------------------------
# Deterministic parameter construction (synthetic init; no checkpoint load)
# ----------------------------------------------------------------------------
def init_params(key, d_model, d_inner, n_head, d_k, d_v):
    keys = iter(jax.random.split(key, 16))

    def dense(fan_in, fan_out):
        w = jax.random.normal(next(keys), (fan_in, fan_out), jnp.float32) / jnp.sqrt(
            jnp.float32(fan_in))
        b = jax.random.normal(next(keys), (1, fan_out), jnp.float32) * 0.02
        return w, b

    wq, bq = dense(d_model, n_head * d_k)
    wk, bk = dense(d_model, n_head * d_k)
    wv, bv = dense(d_model, n_head * d_v)
    wfc, bfc = dense(n_head * d_v, d_model)
    w1, b1 = dense(d_model, d_inner)     # Conv1d(d_model, d_inner, 1) as Linear
    w2, b2 = dense(d_inner, d_model)     # Conv1d(d_inner, d_model, 1) as Linear

    # Fold the 1/sqrt(d_k) softmax temperature into the Q projection (semantics-preserving).
    scale = 1.0 / jnp.sqrt(jnp.float32(d_k))
    wq = wq * scale
    bq = bq * scale

    bf = lambda a: a.astype(jnp.bfloat16)          # weights live in HBM as bf16
    ones = jnp.ones((1, d_model), jnp.float32)
    zeros = jnp.zeros((1, d_model), jnp.float32)
    return (bf(wq), bq, bf(wk), bk, bf(wv), bv, bf(wfc), bfc, ones, zeros,   # MHA + LN1
            bf(w1), b1, bf(w2), b2, ones, zeros)                             # FFN + LN2


# ----------------------------------------------------------------------------
# Pure-JAX reference (identical math, whole batch at once) for a sanity check.
# ----------------------------------------------------------------------------
def reference_forward(x, lengths, params, *, n_head, d_k, d_v):
    B, L, _ = x.shape
    idx = jnp.arange(L, dtype=jnp.int32)
    key_invalid = (idx[None, None, :] >= lengths[:, None, None]).astype(jnp.float32)  # (B,1,L)
    npm = (idx[None, :, None] < lengths[:, None, None]).astype(jnp.float32)           # (B,L,1)
    return _self_attention_block(x.astype(jnp.float32), key_invalid, npm, params,
                                 n_head=n_head, d_k=d_k, d_v=d_v).astype(x.dtype)


if __name__ == "__main__":
    B, L, d_model = 2, 8, 32
    n_head, d_k, d_v, d_inner = 2, 16, 16, 64

    root = jax.random.PRNGKey(0)
    kx, kp = jax.random.split(root)
    x = jax.random.normal(kx, (B, L, d_model), jnp.float32)

    # batch 0: all 8 positions valid; batch 1: last 2 positions padded
    lengths = jnp.array([8, 6], dtype=jnp.int32)

    params = init_params(kp, d_model, d_inner, n_head, d_k, d_v)

    out = self_attention_forward(x, lengths, params, n_head=n_head, d_k=d_k, d_v=d_v)
    out = jax.block_until_ready(out)

    ref = jax.block_until_ready(
        reference_forward(x, lengths, params, n_head=n_head, d_k=d_k, d_v=d_v))

    max_err = float(jnp.max(jnp.abs(out - ref)))
    assert out.shape == (B, L, d_model)
    assert bool(jnp.all(jnp.isfinite(out)))
    assert max_err < 2e-2, f"mismatch vs reference: {max_err}"
    print("KERNEL_OK")
</pallas_src>

<mosaic_0001>
module attributes {stable_mosaic.version = 11 : i64} {
  func.func @self_attention_kernel(%arg0: i32, %arg1: memref<2xi32, #tpu.memory_space<smem>>, %arg2: memref<2x8x32xf32, #tpu.memory_space<vmem>>, %arg3: memref<32x32xbf16, #tpu.memory_space<vmem>>, %arg4: memref<1x32xf32, #tpu.memory_space<vmem>>, %arg5: memref<32x32xbf16, #tpu.memory_space<vmem>>, %arg6: memref<1x32xf32, #tpu.memory_space<vmem>>, %arg7: memref<32x32xbf16, #tpu.memory_space<vmem>>, %arg8: memref<1x32xf32, #tpu.memory_space<vmem>>, %arg9: memref<32x32xbf16, #tpu.memory_space<vmem>>, %arg10: memref<1x32xf32, #tpu.memory_space<vmem>>, %arg11: memref<1x32xf32, #tpu.memory_space<vmem>>, %arg12: memref<1x32xf32, #tpu.memory_space<vmem>>, %arg13: memref<32x64xbf16, #tpu.memory_space<vmem>>, %arg14: memref<1x64xf32, #tpu.memory_space<vmem>>, %arg15: memref<64x32xbf16, #tpu.memory_space<vmem>>, %arg16: memref<1x32xf32, #tpu.memory_space<vmem>>, %arg17: memref<1x32xf32, #tpu.memory_space<vmem>>, %arg18: memref<1x32xf32, #tpu.memory_space<vmem>>, %arg19: memref<2x8x32xf32, #tpu.memory_space<vmem>>) attributes {dimension_semantics = [#tpu.dimension_semantics<parallel>], iteration_bounds = array<i64: 1>, scalar_prefetch = 1 : i64, scratch_operands = 0 : i64, tpu.core_type = #tpu.core_type<tc>, window_params = [{transform_indices = @transform_0, window_bounds = array<i64: 2, 8, 32>}, {pipeline_mode = #tpu.pipeline_mode<synchronous>, transform_indices = @transform_1, window_bounds = array<i64: 32, 32>}, {pipeline_mode = #tpu.pipeline_mode<synchronous>, transform_indices = @transform_2, window_bounds = array<i64: 1, 32>}, {pipeline_mode = #tpu.pipeline_mode<synchronous>, transform_indices = @transform_3, window_bounds = array<i64: 32, 32>}, {pipeline_mode = #tpu.pipeline_mode<synchronous>, transform_indices = @transform_4, window_bounds = array<i64: 1, 32>}, {pipeline_mode = #tpu.pipeline_mode<synchronous>, transform_indices = @transform_5, window_bounds = array<i64: 32, 32>}, {pipeline_mode = #tpu.pipeline_mode<synchronous>, transform_indices = @transform_6, window_bounds = array<i64: 1, 32>}, {pipeline_mode = #tpu.pipeline_mode<synchronous>, transform_indices = @transform_7, window_bounds = array<i64: 32, 32>}, {pipeline_mode = #tpu.pipeline_mode<synchronous>, transform_indices = @transform_8, window_bounds = array<i64: 1, 32>}, {pipeline_mode = #tpu.pipeline_mode<synchronous>, transform_indices = @transform_9, window_bounds = array<i64: 1, 32>}, {pipeline_mode = #tpu.pipeline_mode<synchronous>, transform_indices = @transform_10, window_bounds = array<i64: 1, 32>}, {pipeline_mode = #tpu.pipeline_mode<synchronous>, transform_indices = @transform_11, window_bounds = array<i64: 32, 64>}, {pipeline_mode = #tpu.pipeline_mode<synchronous>, transform_indices = @transform_12, window_bounds = array<i64: 1, 64>}, {pipeline_mode = #tpu.pipeline_mode<synchronous>, transform_indices = @transform_13, window_bounds = array<i64: 64, 32>}, {pipeline_mode = #tpu.pipeline_mode<synchronous>, transform_indices = @transform_14, window_bounds = array<i64: 1, 32>}, {pipeline_mode = #tpu.pipeline_mode<synchronous>, transform_indices = @transform_15, window_bounds = array<i64: 1, 32>}, {pipeline_mode = #tpu.pipeline_mode<synchronous>, transform_indices = @transform_16, window_bounds = array<i64: 1, 32>}, {transform_indices = @transform_17, window_bounds = array<i64: 2, 8, 32>}]} {
    %c0 = arith.constant 0 : index
    %c0_0 = arith.constant 0 : index
    %0 = vector.load %arg3[%c0, %c0_0] : memref<32x32xbf16, #tpu.memory_space<vmem>>, vector<32x32xbf16>
    %c0_1 = arith.constant 0 : index
    %c0_2 = arith.constant 0 : index
    %1 = vector.load %arg4[%c0_1, %c0_2] : memref<1x32xf32, #tpu.memory_space<vmem>>, vector<1x32xf32>
    %c0_3 = arith.constant 0 : index
    %c0_4 = arith.constant 0 : index
    %2 = vector.load %arg5[%c0_3, %c0_4] : memref<32x32xbf16, #tpu.memory_space<vmem>>, vector<32x32xbf16>
    %c0_5 = arith.constant 0 : index
    %c0_6 = arith.constant 0 : index
    %3 = vector.load %arg6[%c0_5, %c0_6] : memref<1x32xf32, #tpu.memory_space<vmem>>, vector<1x32xf32>
    %c0_7 = arith.constant 0 : index
    %c0_8 = arith.constant 0 : index
    %4 = vector.load %arg7[%c0_7, %c0_8] : memref<32x32xbf16, #tpu.memory_space<vmem>>, vector<32x32xbf16>
    %c0_9 = arith.constant 0 : index
    %c0_10 = arith.constant 0 : index
    %5 = vector.load %arg8[%c0_9, %c0_10] : memref<1x32xf32, #tpu.memory_space<vmem>>, vector<1x32xf32>
    %c0_11 = arith.constant 0 : index
    %c0_12 = arith.constant 0 : index
    %6 = vector.load %arg9[%c0_11, %c0_12] : memref<32x32xbf16, #tpu.memory_space<vmem>>, vector<32x32xbf16>
    %c0_13 = arith.constant 0 : index
    %c0_14 = arith.constant 0 : index
    %7 = vector.load %arg10[%c0_13, %c0_14] : memref<1x32xf32, #tpu.memory_space<vmem>>, vector<1x32xf32>
    %c0_15 = arith.constant 0 : index
    %c0_16 = arith.constant 0 : index
    %8 = vector.load %arg11[%c0_15, %c0_16] : memref<1x32xf32, #tpu.memory_space<vmem>>, vector<1x32xf32>
    %c0_17 = arith.constant 0 : index
    %c0_18 = arith.constant 0 : index
    %9 = vector.load %arg12[%c0_17, %c0_18] : memref<1x32xf32, #tpu.memory_space<vmem>>, vector<1x32xf32>
    %c0_19 = arith.constant 0 : index
    %c0_20 = arith.constant 0 : index
    %10 = vector.load %arg13[%c0_19, %c0_20] : memref<32x64xbf16, #tpu.memory_space<vmem>>, vector<32x64xbf16>
    %c0_21 = arith.constant 0 : index
    %c0_22 = arith.constant 0 : index
    %11 = vector.load %arg14[%c0_21, %c0_22] : memref<1x64xf32, #tpu.memory_space<vmem>>, vector<1x64xf32>
    %c0_23 = arith.constant 0 : index
    %c0_24 = arith.constant 0 : index
    %12 = vector.load %arg15[%c0_23, %c0_24] : memref<64x32xbf16, #tpu.memory_space<vmem>>, vector<64x32xbf16>
    %c0_25 = arith.constant 0 : index
    %c0_26 = arith.constant 0 : index
    %13 = vector.load %arg16[%c0_25, %c0_26] : memref<1x32xf32, #tpu.memory_space<vmem>>, vector<1x32xf32>
    %c0_27 = arith.constant 0 : index
    %c0_28 = arith.constant 0 : index
    %14 = vector.load %arg17[%c0_27, %c0_28] : memref<1x32xf32, #tpu.memory_space<vmem>>, vector<1x32xf32>
    %c0_29 = arith.constant 0 : index
    %c0_30 = arith.constant 0 : index
    %15 = vector.load %arg18[%c0_29, %c0_30] : memref<1x32xf32, #tpu.memory_space<vmem>>, vector<1x32xf32>
    %c0_31 = arith.constant 0 : index
    %c0_32 = arith.constant 0 : index
    %c0_33 = arith.constant 0 : index
    %16 = vector.load %arg2[%c0_31, %c0_32, %c0_33] : memref<2x8x32xf32, #tpu.memory_space<vmem>>, vector<2x8x32xf32>
    %c2_i32 = arith.constant 2 : i32
    %17 = arith.muli %arg0, %c2_i32 : i32
    %18 = tpu.iota {dimensions = array<i32: 2>} : vector<1x1x8xi32>
    %19 = tpu.iota {dimensions = array<i32: 1>} : vector<1x8x1xi32>
    %c0_i32 = arith.constant 0 : i32
    %20 = arith.addi %17, %c0_i32 : i32
    %21 = arith.index_cast %20 : i32 to index
    %22 = memref.load %arg1[%21] : memref<2xi32, #tpu.memory_space<smem>>
    %23 = vector.broadcast %22 : i32 to vector<1x1x8xi32>
    %24 = arith.cmpi sge, %18, %23 : vector<1x1x8xi32>
    %25 = arith.extui %24 : vector<1x1x8xi1> to vector<1x1x8xi32>
    %26 = arith.sitofp %25 : vector<1x1x8xi32> to vector<1x1x8xf32>
    %27 = vector.broadcast %22 : i32 to vector<1x8x1xi32>
    %28 = arith.cmpi slt, %19, %27 : vector<1x8x1xi32>
    %29 = arith.extui %28 : vector<1x8x1xi1> to vector<1x8x1xi32>
    %30 = arith.sitofp %29 : vector<1x8x1xi32> to vector<1x8x1xf32>
    %c1_i32 = arith.constant 1 : i32
    %31 = arith.addi %17, %c1_i32 : i32
    %32 = arith.index_cast %31 : i32 to index
    %33 = memref.load %arg1[%32] : memref<2xi32, #tpu.memory_space<smem>>
    %34 = vector.broadcast %33 : i32 to vector<1x1x8xi32>
    %35 = arith.cmpi sge, %18, %34 : vector<1x1x8xi32>
    %36 = arith.extui %35 : vector<1x1x8xi1> to vector<1x1x8xi32>
    %37 = arith.sitofp %36 : vector<1x1x8xi32> to vector<1x1x8xf32>
    %38 = vector.broadcast %33 : i32 to vector<1x8x1xi32>
    %39 = arith.cmpi slt, %19, %38 : vector<1x8x1xi32>
    %40 = arith.extui %39 : vector<1x8x1xi1> to vector<1x8x1xi32>
    %41 = arith.sitofp %40 : vector<1x8x1xi32> to vector<1x8x1xf32>
    %42 = tpu.concatenate %26, %37 in 0 : vector<1x1x8xf32>, vector<1x1x8xf32> -> vector<2x1x8xf32>
    %43 = tpu.concatenate %30, %41 in 0 : vector<1x8x1xf32>, vector<1x8x1xf32> -> vector<2x8x1xf32>
    %44 = vector.shape_cast %16 : vector<2x8x32xf32> to vector<16x32xf32>
    %45 = arith.truncf %44 : vector<16x32xf32> to vector<16x32xbf16>
    %cst = arith.constant dense<0.000000e+00> : vector<16x32xf32>
    %46 = tpu.matmul %45, %0, %cst {dimension_numbers = #tpu.dot_dimension_numbers<[1], [0], [0], [1], [0, 0, 1, 1], [], []>} : vector<16x32xbf16>, vector<32x32xbf16>, vector<16x32xf32> -> vector<16x32xf32>
    %47 = vector.broadcast %1 : vector<1x32xf32> to vector<16x32xf32>
    %48 = arith.addf %46, %47 : vector<16x32xf32>
    %cst_34 = arith.constant dense<0.000000e+00> : vector<16x32xf32>
    %49 = tpu.matmul %45, %2, %cst_34 {dimension_numbers = #tpu.dot_dimension_numbers<[1], [0], [0], [1], [0, 0, 1, 1], [], []>} : vector<16x32xbf16>, vector<32x32xbf16>, vector<16x32xf32> -> vector<16x32xf32>
    %50 = vector.broadcast %3 : vector<1x32xf32> to vector<16x32xf32>
    %51 = arith.addf %49, %50 : vector<16x32xf32>
    %cst_35 = arith.constant dense<0.000000e+00> : vector<16x32xf32>
    %52 = tpu.matmul %45, %4, %cst_35 {dimension_numbers = #tpu.dot_dimension_numbers<[1], [0], [0], [1], [0, 0, 1, 1], [], []>} : vector<16x32xbf16>, vector<32x32xbf16>, vector<16x32xf32> -> vector<16x32xf32>
    %53 = vector.broadcast %5 : vector<1x32xf32> to vector<16x32xf32>
    %54 = arith.addf %52, %53 : vector<16x32xf32>
    %55 = vector.shape_cast %48 : vector<16x32xf32> to vector<2x8x32xf32>
    %56 = vector.shape_cast %51 : vector<16x32xf32> to vector<2x8x32xf32>
    %57 = vector.shape_cast %54 : vector<16x32xf32> to vector<2x8x32xf32>
    %58 = vector.extract_strided_slice %55 {offsets = [0, 0, 0], sizes = [2, 8, 16], strides = [1, 1, 1]} : vector<2x8x32xf32> to vector<2x8x16xf32>
    %59 = vector.extract_strided_slice %55 {offsets = [0, 0, 16], sizes = [2, 8, 16], strides = [1, 1, 1]} : vector<2x8x32xf32> to vector<2x8x16xf32>
    %60 = tpu.concatenate %58, %59 in 0 : vector<2x8x16xf32>, vector<2x8x16xf32> -> vector<4x8x16xf32>
    %61 = vector.extract_strided_slice %56 {offsets = [0, 0, 0], sizes = [2, 8, 16], strides = [1, 1, 1]} : vector<2x8x32xf32> to vector<2x8x16xf32>
    %62 = vector.extract_strided_slice %56 {offsets = [0, 0, 16], sizes = [2, 8, 16], strides = [1, 1, 1]} : vector<2x8x32xf32> to vector<2x8x16xf32>
    %63 = tpu.concatenate %61, %62 in 0 : vector<2x8x16xf32>, vector<2x8x16xf32> -> vector<4x8x16xf32>
    %64 = vector.extract_strided_slice %57 {offsets = [0, 0, 0], sizes = [2, 8, 16], strides = [1, 1, 1]} : vector<2x8x32xf32> to vector<2x8x16xf32>
    %65 = vector.extract_strided_slice %57 {offsets = [0, 0, 16], sizes = [2, 8, 16], strides = [1, 1, 1]} : vector<2x8x32xf32> to vector<2x8x16xf32>
    %66 = tpu.concatenate %64, %65 in 0 : vector<2x8x16xf32>, vector<2x8x16xf32> -> vector<4x8x16xf32>
    %67 = arith.truncf %60 : vector<4x8x16xf32> to vector<4x8x16xbf16>
    %68 = arith.truncf %63 : vector<4x8x16xf32> to vector<4x8x16xbf16>
    "tpu.trace_start"() <{level = 10 : i32, message = "gqd,gkd->gqk"}> : () -> ()
    %cst_36 = arith.constant dense<0.000000e+00> : vector<4x8x8xf32>
    %69 = tpu.matmul %67, %68, %cst_36 {dimension_numbers = #tpu.dot_dimension_numbers<[2], [2], [1], [1], [0, 0, 0, 1, 1, 1], [0], [0]>} : vector<4x8x16xbf16>, vector<4x8x16xbf16>, vector<4x8x8xf32> -> vector<4x8x8xf32>
    "tpu.trace_stop"() : () -> ()
    %70 = tpu.concatenate %42, %42 in 0 : vector<2x1x8xf32>, vector<2x1x8xf32> -> vector<4x1x8xf32>
    %cst_37 = arith.constant 0.000000e+00 : f32
    %71 = vector.broadcast %cst_37 : f32 to vector<4x1x8xf32>
    %72 = arith.cmpf ogt, %70, %71 : vector<4x1x8xf32>
    %cst_38 = arith.constant -1.000000e+09 : f32
    %73 = vector.shape_cast %72 : vector<4x1x8xi1> to vector<4x1x8xi1>
    %74 = vector.broadcast %73 : vector<4x1x8xi1> to vector<4x8x8xi1>
    %75 = vector.broadcast %cst_38 : f32 to vector<4x8x8xf32>
    %76 = arith.select %74, %75, %69 : vector<4x8x8xi1>, vector<4x8x8xf32>
    %cst_39 = arith.constant dense<0xFF800000> : vector<4x8xf32>
    %77 = vector.multi_reduction <maximumf>, %76, %cst_39 [2] : vector<4x8x8xf32> to vector<4x8xf32>
    %78 = vector.shape_cast %77 : vector<4x8xf32> to vector<4x8x1xf32>
    %79 = vector.broadcast %78 : vector<4x8x1xf32> to vector<4x8x8xf32>
    %80 = arith.subf %76, %79 : vector<4x8x8xf32>
    %81 = math.exp %80 : vector<4x8x8xf32>
    %cst_40 = arith.constant dense<0.000000e+00> : vector<4x8xf32>
    %82 = vector.multi_reduction <add>, %81, %cst_40 [2] : vector<4x8x8xf32> to vector<4x8xf32>
    %83 = vector.shape_cast %82 : vector<4x8xf32> to vector<4x8x1xf32>
    %84 = vector.broadcast %83 : vector<4x8x1xf32> to vector<4x8x8xf32>
    %85 = arith.divf %81, %84 : vector<4x8x8xf32>
    %86 = arith.truncf %85 : vector<4x8x8xf32> to vector<4x8x8xbf16>
    %87 = arith.truncf %66 : vector<4x8x16xf32> to vector<4x8x16xbf16>
    "tpu.trace_start"() <{level = 10 : i32, message = "gqk,gkd->gqd"}> : () -> ()
    %cst_41 = arith.constant dense<0.000000e+00> : vector<4x8x16xf32>
    %88 = tpu.matmul %86, %87, %cst_41 {dimension_numbers = #tpu.dot_dimension_numbers<[2], [1], [1], [2], [0, 0, 0, 1, 1, 2], [0], [0]>} : vector<4x8x8xbf16>, vector<4x8x16xbf16>, vector<4x8x16xf32> -> vector<4x8x16xf32>
    "tpu.trace_stop"() : () -> ()
    %89 = vector.extract_strided_slice %88 {offsets = [0, 0, 0], sizes = [2, 8, 16], strides = [1, 1, 1]} : vector<4x8x16xf32> to vector<2x8x16xf32>
    %90 = vector.extract_strided_slice %88 {offsets = [2, 0, 0], sizes = [2, 8, 16], strides = [1, 1, 1]} : vector<4x8x16xf32> to vector<2x8x16xf32>
    %91 = tpu.concatenate %89, %90 in 2 : vector<2x8x16xf32>, vector<2x8x16xf32> -> vector<2x8x32xf32>
    %92 = vector.shape_cast %91 : vector<2x8x32xf32> to vector<16x32xf32>
    %93 = arith.truncf %92 : vector<16x32xf32> to vector<16x32xbf16>
    %cst_42 = arith.constant dense<0.000000e+00> : vector<16x32xf32>
    %94 = tpu.matmul %93, %6, %cst_42 {dimension_numbers = #tpu.dot_dimension_numbers<[1], [0], [0], [1], [0, 0, 1, 1], [], []>} : vector<16x32xbf16>, vector<32x32xbf16>, vector<16x32xf32> -> vector<16x32xf32>
    %95 = vector.broadcast %7 : vector<1x32xf32> to vector<16x32xf32>
    %96 = arith.addf %94, %95 : vector<16x32xf32>
    %97 = arith.addf %96, %44 : vector<16x32xf32>
    %cst_43 = arith.constant dense<0.000000e+00> : vector<16xf32>
    %98 = vector.multi_reduction <add>, %97, %cst_43 [1] : vector<16x32xf32> to vector<16xf32>
    %99 = vector.shape_cast %98 : vector<16xf32> to vector<16x1xf32>
    %cst_44 = arith.constant 3.200000e+01 : f32
    %100 = vector.broadcast %cst_44 : f32 to vector<16x1xf32>
    %101 = arith.divf %99, %100 : vector<16x1xf32>
    %102 = vector.broadcast %101 : vector<16x1xf32> to vector<16x32xf32>
    %103 = arith.subf %97, %102 : vector<16x32xf32>
    %104 = arith.mulf %103, %103 : vector<16x32xf32>
    %cst_45 = arith.constant dense<0.000000e+00> : vector<16xf32>
    %105 = vector.multi_reduction <add>, %104, %cst_45 [1] : vector<16x32xf32> to vector<16xf32>
    %106 = vector.shape_cast %105 : vector<16xf32> to vector<16x1xf32>
    %cst_46 = arith.constant 3.200000e+01 : f32
    %107 = vector.broadcast %cst_46 : f32 to vector<16x1xf32>
    %108 = arith.divf %106, %107 : vector<16x1xf32>
    %109 = vector.broadcast %101 : vector<16x1xf32> to vector<16x32xf32>
    %110 = arith.subf %97, %109 : vector<16x32xf32>
    %cst_47 = arith.constant 9.99999974E-6 : f32
    %111 = vector.broadcast %cst_47 : f32 to vector<16x1xf32>
    %112 = arith.addf %108, %111 : vector<16x1xf32>
    %113 = math.rsqrt %112 : vector<16x1xf32>
    %114 = vector.broadcast %113 : vector<16x1xf32> to vector<16x32xf32>
    %115 = arith.mulf %110, %114 : vector<16x32xf32>
    %116 = vector.broadcast %8 : vector<1x32xf32> to vector<16x32xf32>
    %117 = arith.mulf %115, %116 : vector<16x32xf32>
    %118 = vector.broadcast %9 : vector<1x32xf32> to vector<16x32xf32>
    %119 = arith.addf %117, %118 : vector<16x32xf32>
    %120 = vector.shape_cast %119 : vector<16x32xf32> to vector<2x8x32xf32>
    %121 = vector.broadcast %43 : vector<2x8x1xf32> to vector<2x8x32xf32>
    %122 = arith.mulf %120, %121 : vector<2x8x32xf32>
    %123 = vector.shape_cast %122 : vector<2x8x32xf32> to vector<16x32xf32>
    %124 = arith.truncf %123 : vector<16x32xf32> to vector<16x32xbf16>
    %cst_48 = arith.constant dense<0.000000e+00> : vector<16x64xf32>
    %125 = tpu.matmul %124, %10, %cst_48 {dimension_numbers = #tpu.dot_dimension_numbers<[1], [0], [0], [1], [0, 0, 1, 1], [], []>} : vector<16x32xbf16>, vector<32x64xbf16>, vector<16x64xf32> -> vector<16x64xf32>
    %126 = vector.broadcast %11 : vector<1x64xf32> to vector<16x64xf32>
    %127 = arith.addf %125, %126 : vector<16x64xf32>
    %cst_49 = arith.constant 0.000000e+00 : f32
    %128 = vector.broadcast %cst_49 : f32 to vector<16x64xf32>
    %129 = arith.maximumf %127, %128 : vector<16x64xf32>
    %130 = arith.truncf %129 : vector<16x64xf32> to vector<16x64xbf16>
    %cst_50 = arith.constant dense<0.000000e+00> : vector<16x32xf32>
    %131 = tpu.matmul %130, %12, %cst_50 {dimension_numbers = #tpu.dot_dimension_numbers<[1], [0], [0], [1], [0, 0, 1, 1], [], []>} : vector<16x64xbf16>, vector<64x32xbf16>, vector<16x32xf32> -> vector<16x32xf32>
    %132 = vector.broadcast %13 : vector<1x32xf32> to vector<16x32xf32>
    %133 = arith.addf %131, %132 : vector<16x32xf32>
    %134 = arith.addf %133, %123 : vector<16x32xf32>
    %cst_51 = arith.constant dense<0.000000e+00> : vector<16xf32>
    %135 = vector.multi_reduction <add>, %134, %cst_51 [1] : vector<16x32xf32> to vector<16xf32>
    %136 = vector.shape_cast %135 : vector<16xf32> to vector<16x1xf32>
    %cst_52 = arith.constant 3.200000e+01 : f32
    %137 = vector.broadcast %cst_52 : f32 to vector<16x1xf32>
    %138 = arith.divf %136, %137 : vector<16x1xf32>
    %139 = vector.broadcast %138 : vector<16x1xf32> to vector<16x32xf32>
    %140 = arith.subf %134, %139 : vector<16x32xf32>
    %141 = arith.mulf %140, %140 : vector<16x32xf32>
    %cst_53 = arith.constant dense<0.000000e+00> : vector<16xf32>
    %142 = vector.multi_reduction <add>, %141, %cst_53 [1] : vector<16x32xf32> to vector<16xf32>
    %143 = vector.shape_cast %142 : vector<16xf32> to vector<16x1xf32>
    %cst_54 = arith.constant 3.200000e+01 : f32
    %144 = vector.broadcast %cst_54 : f32 to vector<16x1xf32>
    %145 = arith.divf %143, %144 : vector<16x1xf32>
    %146 = vector.broadcast %138 : vector<16x1xf32> to vector<16x32xf32>
    %147 = arith.subf %134, %146 : vector<16x32xf32>
    %cst_55 = arith.constant 9.99999974E-6 : f32
    %148 = vector.broadcast %cst_55 : f32 to vector<16x1xf32>
    %149 = arith.addf %145, %148 : vector<16x1xf32>
    %150 = math.rsqrt %149 : vector<16x1xf32>
    %151 = vector.broadcast %150 : vector<16x1xf32> to vector<16x32xf32>
    %152 = arith.mulf %147, %151 : vector<16x32xf32>
    %153 = vector.broadcast %14 : vector<1x32xf32> to vector<16x32xf32>
    %154 = arith.mulf %152, %153 : vector<16x32xf32>
    %155 = vector.broadcast %15 : vector<1x32xf32> to vector<16x32xf32>
    %156 = arith.addf %154, %155 : vector<16x32xf32>
    %157 = vector.shape_cast %156 : vector<16x32xf32> to vector<2x8x32xf32>
    %158 = vector.broadcast %43 : vector<2x8x1xf32> to vector<2x8x32xf32>
    %159 = arith.mulf %157, %158 : vector<2x8x32xf32>
    %c0_56 = arith.constant 0 : index
    %c0_57 = arith.constant 0 : index
    %c0_58 = arith.constant 0 : index
    %160 = vector.load %arg19[%c0_56, %c0_57, %c0_58] : memref<2x8x32xf32, #tpu.memory_space<vmem>>, vector<2x8x32xf32>
    tpu.vector_store %arg19[%c0_56, %c0_57, %c0_58], %159 {strides = array<i32>} : memref<2x8x32xf32, #tpu.memory_space<vmem>>, vector<2x8x32xf32>,
    return
  }
  func.func @transform_0(%arg0: i32, %arg1: memref<2xi32, #tpu.memory_space<smem>>) -> (i32, i32, i32) {
    %c0_i32 = arith.constant 0 : i32
    %c0_i32_0 = arith.constant 0 : i32
    %c0_i32_1 = arith.constant 0 : i32
    return %arg0, %c0_i32, %c0_i32_0 : i32, i32, i32
  }
  func.func @transform_1(%arg0: i32, %arg1: memref<2xi32, #tpu.memory_space<smem>>) -> (i32, i32) {
    %c0_i32 = arith.constant 0 : i32
    %c0_i32_0 = arith.constant 0 : i32
    %c0_i32_1 = arith.constant 0 : i32
    return %c0_i32, %c0_i32_0 : i32, i32
  }
  func.func @transform_2(%arg0: i32, %arg1: memref<2xi32, #tpu.memory_space<smem>>) -> (i32, i32) {
    %c0_i32 = arith.constant 0 : i32
    %c0_i32_0 = arith.constant 0 : i32
    %c0_i32_1 = arith.constant 0 : i32
    return %c0_i32, %c0_i32_0 : i32, i32
  }
  func.func @transform_3(%arg0: i32, %arg1: memref<2xi32, #tpu.memory_space<smem>>) -> (i32, i32) {
    %c0_i32 = arith.constant 0 : i32
    %c0_i32_0 = arith.constant 0 : i32
    %c0_i32_1 = arith.constant 0 : i32
    return %c0_i32, %c0_i32_0 : i32, i32
  }
  func.func @transform_4(%arg0: i32, %arg1: memref<2xi32, #tpu.memory_space<smem>>) -> (i32, i32) {
    %c0_i32 = arith.constant 0 : i32
    %c0_i32_0 = arith.constant 0 : i32
    %c0_i32_1 = arith.constant 0 : i32
    return %c0_i32, %c0_i32_0 : i32, i32
  }
  func.func @transform_5(%arg0: i32, %arg1: memref<2xi32, #tpu.memory_space<smem>>) -> (i32, i32) {
    %c0_i32 = arith.constant 0 : i32
    %c0_i32_0 = arith.constant 0 : i32
    %c0_i32_1 = arith.constant 0 : i32
    return %c0_i32, %c0_i32_0 : i32, i32
  }
  func.func @transform_6(%arg0: i32, %arg1: memref<2xi32, #tpu.memory_space<smem>>) -> (i32, i32) {
    %c0_i32 = arith.constant 0 : i32
    %c0_i32_0 = arith.constant 0 : i32
    %c0_i32_1 = arith.constant 0 : i32
    return %c0_i32, %c0_i32_0 : i32, i32
  }
  func.func @transform_7(%arg0: i32, %arg1: memref<2xi32, #tpu.memory_space<smem>>) -> (i32, i32) {
    %c0_i32 = arith.constant 0 : i32
    %c0_i32_0 = arith.constant 0 : i32
    %c0_i32_1 = arith.constant 0 : i32
    return %c0_i32, %c0_i32_0 : i32, i32
  }
  func.func @transform_8(%arg0: i32, %arg1: memref<2xi32, #tpu.memory_space<smem>>) -> (i32, i32) {
    %c0_i32 = arith.constant 0 : i32
    %c0_i32_0 = arith.constant 0 : i32
    %c0_i32_1 = arith.constant 0 : i32
    return %c0_i32, %c0_i32_0 : i32, i32
  }
  func.func @transform_9(%arg0: i32, %arg1: memref<2xi32, #tpu.memory_space<smem>>) -> (i32, i32) {
    %c0_i32 = arith.constant 0 : i32
    %c0_i32_0 = arith.constant 0 : i32
    %c0_i32_1 = arith.constant 0 : i32
    return %c0_i32, %c0_i32_0 : i32, i32
  }
  func.func @transform_10(%arg0: i32, %arg1: memref<2xi32, #tpu.memory_space<smem>>) -> (i32, i32) {
    %c0_i32 = arith.constant 0 : i32
    %c0_i32_0 = arith.constant 0 : i32
    %c0_i32_1 = arith.constant 0 : i32
    return %c0_i32, %c0_i32_0 : i32, i32
  }
  func.func @transform_11(%arg0: i32, %arg1: memref<2xi32, #tpu.memory_space<smem>>) -> (i32, i32) {
    %c0_i32 = arith.constant 0 : i32
    %c0_i32_0 = arith.constant 0 : i32
    %c0_i32_1 = arith.constant 0 : i32
    return %c0_i32, %c0_i32_0 : i32, i32
  }
  func.func @transform_12(%arg0: i32, %arg1: memref<2xi32, #tpu.memory_space<smem>>) -> (i32, i32) {
    %c0_i32 = arith.constant 0 : i32
    %c0_i32_0 = arith.constant 0 : i32
    %c0_i32_1 = arith.constant 0 : i32
    return %c0_i32, %c0_i32_0 : i32, i32
  }
  func.func @transform_13(%arg0: i32, %arg1: memref<2xi32, #tpu.memory_space<smem>>) -> (i32, i32) {
    %c0_i32 = arith.constant 0 : i32
    %c0_i32_0 = arith.constant 0 : i32
    %c0_i32_1 = arith.constant 0 : i32
    return %c0_i32, %c0_i32_0 : i32, i32
  }
  func.func @transform_14(%arg0: i32, %arg1: memref<2xi32, #tpu.memory_space<smem>>) -> (i32, i32) {
    %c0_i32 = arith.constant 0 : i32
    %c0_i32_0 = arith.constant 0 : i32
    %c0_i32_1 = arith.constant 0 : i32
    return %c0_i32, %c0_i32_0 : i32, i32
  }
  func.func @transform_15(%arg0: i32, %arg1: memref<2xi32, #tpu.memory_space<smem>>) -> (i32, i32) {
    %c0_i32 = arith.constant 0 : i32
    %c0_i32_0 = arith.constant 0 : i32
    %c0_i32_1 = arith.constant 0 : i32
    return %c0_i32, %c0_i32_0 : i32, i32
  }
  func.func @transform_16(%arg0: i32, %arg1: memref<2xi32, #tpu.memory_space<smem>>) -> (i32, i32) {
    %c0_i32 = arith.constant 0 : i32
    %c0_i32_0 = arith.constant 0 : i32
    %c0_i32_1 = arith.constant 0 : i32
    return %c0_i32, %c0_i32_0 : i32, i32
  }
  func.func @transform_17(%arg0: i32, %arg1: memref<2xi32, #tpu.memory_space<smem>>) -> (i32, i32, i32) {
    %c0_i32 = arith.constant 0 : i32
    %c0_i32_0 = arith.constant 0 : i32
    %c0_i32_1 = arith.constant 0 : i32
    return %arg0, %c0_i32, %c0_i32_0 : i32, i32, i32
  }
}

</mosaic_0001>

<bundles_post_ra>
// kernel: tpu_custom_call.1
= control target key start
LH: loop header
LB: loop body
LE: loop exit
PB: predicated region body
PF: predicated region fallthrough
CT: control target
= control target key end

     0   :  { %s1961_s0 = inlined_call_operand.hbm [shape: s32[2], index: 0, kind: input, shape index: {}]   ;;  %s1962_s1 = inlined_call_operand.vmem [shape: f32[2,8,32], index: 1, kind: input, shape index: {}]   ;;  %s1963_s2 = inlined_call_operand.vmem [shape: bf16[32,32], index: 2, kind: input, shape index: {}]   ;;  %s1964_s3 = inlined_call_operand.vmem [shape: f32[1,32], index: 3, kind: input, shape index: {}]   ;;  %s1965_s4 = inlined_call_operand.vmem [shape: bf16[32,32], index: 4, kind: input, shape index: {}]   ;;  %s1966_s5 = inlined_call_operand.vmem [shape: f32[1,32], index: 5, kind: input, shape index: {}]   ;;  %s1967_s6 = inlined_call_operand.hbm [shape: bf16[32,32], index: 6, kind: input, shape index: {}]   ;;  %s1968_s7 = inlined_call_operand.hbm [shape: f32[1,32], index: 7, kind: input, shape index: {}]   ;;  %s1969_s8 = inlined_call_operand.hbm [shape: bf16[32,32], index: 8, kind: input, shape index: {}]   ;;  %s1970_s9 = inlined_call_operand.hbm [shape: f32[1,32], index: 9, kind: input, shape index: {}]   ;;  %s1971_s10 = inlined_call_operand.vmem [shape: f32[1,32], index: 10, kind: input, shape index: {}]   ;;  %s1972_s11 = inlined_call_operand.vmem [shape: f32[1,32], index: 11, kind: input, shape index: {}]   ;;  %s1973_s12 = inlined_call_operand.vmem [shape: bf16[32,64], index: 12, kind: input, shape index: {}]   ;;  %s1974_s13 = inlined_call_operand.vmem [shape: f32[1,64], index: 13, kind: input, shape index: {}]   ;;  %s1975_s14 = inlined_call_operand.vmem [shape: bf16[64,32], index: 14, kind: input, shape index: {}]   ;;  %s1976_s15 = inlined_call_operand.vmem [shape: f32[1,32], index: 15, kind: input, shape index: {}]   ;;  %s1977_s16 = inlined_call_operand.vmem [shape: f32[1,32], index: 16, kind: input, shape index: {}]   ;;  %s1978_s17 = inlined_call_operand.vmem [shape: f32[1,32], index: 17, kind: input, shape index: {}]   ;;  %s1979_s18 = inlined_call_operand.hbm [shape: f32[2,8,32], index: 18, kind: output, shape index: {}]  }
   0x1   :  { %1983 = sst [smem:[#allocation18_spill]] %s1961_s0 }
   0x2   :  { %1984 = sst [smem:[#allocation19_spill]] %s1962_s1  ;;  %s1987_s29 = sld [smem:[#allocation18_spill]] }
   0x3   :  { %1985 = sst [smem:[#allocation20_spill]] %s1963_s2 }
   0x4   :  { %1986 = sst [smem:[#allocation21_spill]] %s1972_s11 }
   0x8   :  { %s1428_s11 = scalar_lea.hbm %s1987_s29, 16 }
   0x9   :  { %p1429_p0 = scmp.ne.s32.totalorder %s1987_s29, %s1428_s11  ;;  %p1432_p1 = scmp.lt.u32.totalorder %s1428_s11, %s1987_s29 }
   0xb   :  { %p1434_p2 = pnand %p1432_p1, %p1429_p0 }
   0xd   :  { %1437 = shalt.err (!%p1434_p2)  }
   0xe   :  { %s1558_s20 = smov [#allocation3]  }
   0xf   :  { %24 = dma.hbm_to_smem %s1987_s29, 16, %s1558_s20, [#allocation2] }
  0x10   :  { %1548 = dma.done.wait [#allocation2], 16 }
  0x11   :  { %1549 = vsyncadd [#allocation2], 4294967280 }
  0x12   :  { %26 = sfence }
  0x13   :  { %27 = vsyncpa [#allocation5], 0 }
  0x14   :  { %28 = vsyncpa [#allocation8], 0 }
  0x15   :  { %29 = vsyncpa [#allocation11], 0 }
  0x16   :  { %30 = vsyncpa [#allocation6], 0  ;;  %s1559_s2 = smov [#allocation7]   ;;  %s1560_s24 = smov [#allocation4]  }
  0x17   :  { %s59_s23 = sshll.u32 %s1559_s2, 4  ;;  %s46_s25 = sshll.u32 %s1560_s24, 4  ;;  %s60_s23 = int_to_ptr.vmem [resolvable:$true] %s59_s23  ;;  %s1680_s25 = int_to_ptr.vmem [resolvable:$true] %s46_s25 }
  0x18   :  { %s1438_s27 = scalar_lea.hbm %s1968_s7, 16 }
  0x19   :  { %p1439_p3 = scmp.ne.s32.totalorder %s1968_s7, %s1438_s27  ;;  %p1442_p4 = scmp.lt.u32.totalorder %s1438_s27, %s1968_s7 }
  0x1b   :  { %p1444_p5 = pnand %p1442_p4, %p1439_p3 }
  0x1d   :  { %1447 = shalt.err (!%p1444_p5)
}
  0x1e   :  { %s1448_s19 = scalar_lea.vmem %s60_s23, 16  ;;  %s1452_s1 = scalar_lea.vmem %s60_s23, 32 }
  0x1f   :  { %p1449_p6 = scmp.ne.s32.totalorder %s60_s23, %s1448_s19  ;;  %p1453_p7 = scmp.lt.s32.totalorder %s60_s23, %s60_s23 }
  0x20   :  { %p1454_p8 = scmp.lt.s32.totalorder %s1452_s1, %s1448_s19 }
  0x22   :  { %p1455_p9 = por %p1454_p8, %p1453_p7 }
  0x24   :  { %p1456_p10 = pnand %p1455_p9, %p1449_p6 }
  0x26   :  { %1459 = shalt.err (!%p1456_p10)
}
  0x27   :  { %62 = dma.hbm_to_vmem [thread:$0]  %s1968_s7, 16, %s60_s23, [#allocation8]  }
  0x28   :  { %s1460_s24 = scalar_lea.hbm %s1967_s6, 256 }
  0x29   :  { %p1461_p11 = scmp.ne.s32.totalorder %s1967_s6, %s1460_s24  ;;  %p1464_p12 = scmp.lt.u32.totalorder %s1460_s24, %s1967_s6 }
  0x2b   :  { %p1466_p13 = pnand %p1464_p12, %p1461_p11 }
  0x2d   :  { %1469 = shalt.err (!%p1466_p13)
}
  0x2e   :  { %s1470_s29 = scalar_lea.vmem %s1680_s25, 256  ;;  %p1475_p1 = scmp.lt.s32.totalorder %s1680_s25, %s1680_s25 }
  0x2f   :  { %p1471_p0 = scmp.ne.s32.totalorder %s1680_s25, %s1470_s29  ;;  %p1476_p2 = scmp.lt.s32.totalorder %s1470_s29, %s1470_s29 }
  0x31   :  { %p1477_p3 = por %p1476_p2, %p1475_p1 }
  0x33   :  { %p1478_p4 = pnand %p1477_p3, %p1471_p0 }
  0x35   :  { %1481 = shalt.err (!%p1478_p4)
}
  0x36   :  { %s1561_s7 = smov 64   ;;  %s1562_s23 = smov 4  }
  0x37   :  { %52 = dma.hbm_to_vmem [thread:$0]  %s1967_s6, 256, %s1680_s25, [#allocation5], %s1561_s7, %s1561_s7, %s1562_s23  }
  0x38   :  { %s1563_s19 = smov [#allocation9]   ;;  %s1564_s20 = smov [#allocation10]  }
  0x39   :  { %s68_s1 = sshll.u32 %s1563_s19, 4  ;;  %s81_s21 = sshll.u32 %s1564_s20, 4  ;;  %s69_s1 = int_to_ptr.vmem [resolvable:$true] %s68_s1  ;;  %s82_s21 = int_to_ptr.vmem [resolvable:$true] %s81_s21 }
  0x3a   :  { %s1482_s24 = scalar_lea.hbm %s1969_s8, 256 }
  0x3b   :  { %p1483_p5 = scmp.ne.s32.totalorder %s1969_s8, %s1482_s24  ;;  %p1486_p6 = scmp.lt.u32.totalorder %s1482_s24, %s1969_s8 }
  0x3d   :  { %p1488_p7 = pnand %p1486_p6, %p1483_p5 }
  0x3f   :  { %1491 = shalt.err (!%p1488_p7)
}
  0x40   :  { %s1492_s6 = scalar_lea.vmem %s69_s1, 256  ;;  %p1497_p9 = scmp.lt.s32.totalorder %s69_s1, %s69_s1 }
  0x41   :  { %p1493_p8 = scmp.ne.s32.totalorder %s69_s1, %s1492_s6  ;;  %p1498_p10 = scmp.lt.s32.totalorder %s1492_s6, %s1492_s6 }
  0x43   :  { %p1499_p11 = por %p1498_p10, %p1497_p9 }
  0x45   :  { %p1500_p12 = pnand %p1499_p11, %p1493_p8 }
  0x47   :  { %1503 = shalt.err (!%p1500_p12)
}
  0x48   :  { %74 = dma.hbm_to_vmem [thread:$0]  %s1969_s8, 256, %s69_s1, [#allocation8], %s1561_s7, %s1561_s7, %s1562_s23  }
  0x49   :  { %s1504_s19 = scalar_lea.hbm %s1970_s9, 16 }
  0x4a   :  { %p1505_p13 = scmp.ne.s32.totalorder %s1970_s9, %s1504_s19  ;;  %p1508_p0 = scmp.lt.u32.totalorder %s1504_s19, %s1970_s9 }
  0x4c   :  { %p1510_p1 = pnand %p1508_p0, %p1505_p13 }
  0x4e   :  { %1513 = shalt.err (!%p1510_p1)
}
  0x4f   :  { %s1514_s11 = scalar_lea.vmem %s82_s21, 16  ;;  %s1518_s26 = scalar_lea.vmem %s82_s21, 32 }
  0x50   :  { %p1515_p2 = scmp.ne.s32.totalorder %s82_s21, %s1514_s11  ;;  %p1519_p3 = scmp.lt.s32.totalorder %s82_s21, %s82_s21 }
  0x51   :  { %p1520_p4 = scmp.lt.s32.totalorder %s1518_s26, %s1514_s11 }
  0x53   :  { %p1521_p5 = por %p1520_p4, %p1519_p3 }
  0x55   :  { %p1522_p6 = pnand %p1521_p5, %p1515_p2 }
  0x57   :  { %1525 = shalt.err (!%p1522_p6)
}
  0x58   :  { %84 = dma.hbm_to_vmem [thread:$0]  %s1970_s9, 16, %s82_s21, [#allocation11]  }
  0x59   :  { %1550 = dma.done.wait [#allocation5], 256  }
  0x5a   :  { %1551 = vsyncadd [#allocation5], 4294967040 }
  0x5b   :  { %1552 = dma.done.wait [#allocation8], 272  }
  0x5c   :  { %1553 = vsyncadd [#allocation8], 4294967024 }
  0x5d   :  { %1554 = dma.done.wait [#allocation11], 16  }
  0x5e   :  { %1555 = vsyncadd [#allocation11], 4294967280  ;;  %v1565_v0 = vmov 0.0   ;;  %vm1566_vm0 = vmmov 0   ;;  %v1390_v1 = vld [vmem:[%s1965_s4] sm:$0xff]   ;;  %v1391_v2 = vld [vmem:[%s1965_s4 + $0x8] sm:$0xff]   ;;  %v155_v57 = vlaneseq }
  0x5f   :  { %1256 = vmatprep.subr.bf16.mxu1 %v1565_v0  ;;  %1248 = vmatprep.subr.bf16.mxu0 %v1565_v0  ;;  %s1988_s6 = sld [smem:[#allocation20_spill]]  ;;  %s1989_s30 = sld [smem:[#allocation19_spill]]  ;;  %vm195_vm1 = vcmask 261120   ;;  %v1394_v8 = vld [vmem:[#allocation4] sm:$0xff]   ;;  %v1395_v9 = vld [vmem:[#allocation4 + $0x8] sm:$0xff]   ;;  %vm390_vm2 = vcmask 130048  }
  0x60   :  { %1260 = vmatprep.mubr.msk.bf16.mxu1 %vm1566_vm0, %v1565_v0  ;;  %1252 = vmatprep.mubr.msk.bf16.mxu0 %vm1566_vm0, %v1565_v0  ;;  %v1178_v10 = vld [vmem:[%s1966_s5] ss:$0 sm:$0xff]  ;;  %s1567_s5 = smov 112   ;;  %v1182_v30 = vld [vmem:[#allocation7] ss:$0 sm:$0xff]  ;;  %v1568_v40 = vmov 0  }
  0x61   :  { %1257 = vmatpush3.bf16.msra.mxu1 %v1390_v1  ;;  %v1174_v14 = vld [vmem:[%s1964_s3] ss:$0 sm:$0xff]  ;;  %1383 = vset.pattern.permute.xlu1 %v1568_v40  ;;  %vm649_vm3 = vcmask 1043456   ;;  %s1822_s3 = sld [smem:[#allocation3]]  ;;  %s1824_s26 = sld [smem:[#allocation3 + $0x1]]  ;;  %v156_v58 = vand.u32 127, %v155_v57 }
  0x62   :  { %1258 = vmatprep.subr.bf16.mxu1 %v1565_v0  ;;  %1389 = vset.pattern.permute.xlu0 %v1568_v40  ;;  %v1833_v62 = vshrl.u32 %v155_v57, 7  ;;  %vm593_vm9 = vcmask 64512   ;;  %s1569_s8 = smov 16   ;;  %s1990_s0 = sld [smem:[#allocation21_spill]]  ;;  %vm1057_vm13 = vcmask 523264  }
  0x64   :  { %v581_v1 = vsub.s32 0, %v1833_v62 }
  0x65   :  { %v1392_v3 = vld [vmem:[%s1988_s6] sm:$0xff]   ;;  %v1759_v5 = vld [vmem:[%s1989_s30 + $0x8] sm:$0xff]  ;;  %1259 = vmatpush3.bf16.msra.mxu1 %v1391_v2 }
  0x66   :  { %v1754_v4 = vld [vmem:[%s1989_s30] sm:$0xff]  ;;  %1249 = vmatpush3.bf16.msra.mxu0 %v1392_v3  ;;  %v1393_v6 = vld [vmem:[%s1988_s6 + $0x8] sm:$0xff]   ;;  %1272 = vmatprep.subr.bf16.mxu1 %v1565_v0 }
  0x67   :  { %v176_v7 = vpack.c.bf16 %v1759_v5, %v1754_v4  ;;  %1250 = vmatprep.subr.bf16.mxu0 %v1565_v0  ;;  %v160_v59 = vstv %s1822_s3  ;;  %v169_v60 = vstv %s1824_s26  ;;  %s1570_s3 = smov [#allocation12]  }
  0x68   :  { %vm161_vm4 = vcmp.ge.s32.totalorder %v156_v58, %v160_v59  ;;  %vm170_vm5 = vcmp.ge.s32.totalorder %v156_v58, %v169_v60  ;;  %vm164_vm11 = vcmp.lt.s32.totalorder %v1833_v62, %v160_v59  ;;  %vm173_vm12 = vcmp.lt.s32.totalorder %v1833_v62, %v169_v60  ;;  %v1399_v59 = vld [vmem:[%s1973_s12 + $0x8] sm:$0xff]   ;;  %v1400_v60 = vld [vmem:[%s1975_s14] sm:$0xff]   ;;  %s1155_s26 = sshll.u32 %s1570_s3, 4  ;;  %s1156_s26 = int_to_ptr.vmem [resolvable:$true] %s1155_s26 }
  0x69   :  { %1261 = vmatmul.mubr.msk.bf16.vlgmr.msra.gmra.mrb[0].mxu1 %vm195_vm1, %v176_v7  ;;  %v1169_v61 = vsel %vm161_vm4, 1.0, %v1565_v0  ;;  %v1172_v63 = vsel %vm170_vm5, 1.0, %v1565_v0  ;;  %v1401_v62 = vld [vmem:[%s1975_s14 + $0x8] sm:$0xff]   ;;  %p1531_p8 = scmp.lt.s32.totalorder %s1156_s26, %s1156_s26 }
  0x6a   :  { %1251 = vmatpush3.bf16.msra.mxu0 %v1393_v6  ;;  %1274 = vmatprep.mubr.msk.bf16.mxu1 %vm1566_vm0, %v1565_v0  ;;  %vm575_vm6 = vcmp.gt.f32.partialorder %v1169_v61, 0.0  ;;  %vm576_vm7 = vcmp.gt.f32.partialorder %v1172_v63, 0.0 }
  0x6b   :  { %1264 = vmatprep.subr.bf16.mxu0 %v1565_v0  ;;  %v577_v2 = vsel %vm575_vm6, 1, %v1568_v40  ;;  %v578_v3 = vsel %vm576_vm7, 1, %v1568_v40 }
  0x6c   :  { %v582_v6 = vrot.slane %v577_v2, %v581_v1 }
  0x6d   :  { %1253 = vmatmul.mubr.msk.bf16.vlgmr.msra.gmra.mrb[0].mxu0 %vm195_vm1, %v176_v7 }
  0x6e   :  { %1265 = vmatpush3.bf16.msra.mxu0 %v1394_v8  ;;  %1268 = vmatprep.mubr.msk.bf16.mxu0 %vm1566_vm0, %v1565_v0  ;;  %vm587_vm8 = vcmp.eq.s32.totalorder %v582_v6, 1 }
  0x6f   :  { %1266 = vmatprep.subr.bf16.mxu0 %v1565_v0 }
  0x72   :  { %1267 = vmatpush3.bf16.msra.mxu0 %v1395_v9 }
  0x73   :  { %1278 = vmatprep.subr.bf16.mxu0 %v1565_v0 }
  0x75   :  { %1269 = vmatmul.mubr.msk.bf16.vlgmr.msra.gmra.mrb[4].mxu0 %vm195_vm1, %v176_v7  ;;  %v586_v7 = vrot.slane %v578_v3, %v581_v1 }
  0x76   :  { %1280 = vmatprep.mubr.msk.bf16.mxu0 %vm1566_vm0, %v1565_v0 }
  0x77   :  { %vm588_vm10 = vcmp.eq.s32.totalorder %v586_v7, 1 }
 0x13c   :  { %v292_v11 = vpop.f32.mrb[0].mxu1 }
 0x13d   :  { %v293_v12 = vadd.f32 %v1178_v10, %v292_v11  ;;  %v1262_v13 = vpop.f32.mrb[1].mxu1 }
 0x13e   :  { %v295_v15 = vpop.f32.mrb[2].mxu1 }
 0x13f   :  { %v386_v17 = vpack.c.bf16 %v293_v12, %v293_v12  ;;  %v296_v18 = vadd.f32 %v1178_v10, %v295_v15  ;;  %v1263_v19 = vpop.f32.mrb[3].mxu1 }
 0x140   :  { %v233_v16 = vpop.f32.mrb[0].mxu0 }
 0x141   :  { %v1254_v20 = vpop.f32.mrb[1].mxu0  ;;  %v234_v21 = vadd.f32 %v1174_v14, %v233_v16  ;;  %v387_v23 = vpack.c.bf16 %v296_v18, %v296_v18  ;;  %v395_v24 = vsel %vm390_vm2, %v386_v17, 0  ;;  %v1363_v25 = vpack.i.bf16 %v296_v18, %v293_v12 }
 0x142   :  { %v236_v22 = vpop.f32.mrb[2].mxu0  ;;  %1273 = vmatpush3.bf16.xpose.msra.mxu1 %v395_v24 }
 0x143   :  { %v1255_v26 = vpop.f32.mrb[3].mxu0  ;;  %v237_v27 = vadd.f32 %v1174_v14, %v236_v22  ;;  %1364 = vrot.lane.b32.xlu0 %v1363_v25, %s1567_s5  ;;  %v441_v28 = vsel %vm390_vm2, %v387_v23, 0  ;;  %1284 = vmatprep.subr.bf16.mxu1 %v1565_v0  ;;  %v382_v31 = vpack.c.bf16 %v234_v21, %v234_v21 }
 0x144   :  { %1279 = vmatpush3.bf16.xpose.msra.mxu0 %v441_v28 }
 0x145   :  { %v1368_v29 = vpack.i.bf16 %v237_v27, %v234_v21  ;;  %1290 = vmatprep.subr.bf16.mxu0 %v1565_v0  ;;  %v383_v36 = vpack.c.bf16 %v237_v27, %v237_v27 }
 0x147   :  { %1369 = vrot.lane.b32.xlu0 %v1368_v29, %s1567_s5 }
 0x148   :  { %v351_v32 = vpop.f32.mrb[4].mxu0 }
 0x149   :  { %v1792_v33 = vadd.f32 %v1182_v30, %v351_v32  ;;  %v1270_v34 = vpop.f32.mrb[5].mxu0  ;;  %1275 = vmatmul.mubr.msk.bf16.vlgmr.msra.gmra.mrb[4].mxu1 %vm390_vm2, %v382_v31 }
 0x14a   :  { %v354_v35 = vpop.f32.mrb[6].mxu0  ;;  %1286 = vmatprep.mubr.msk.bf16.mxu1 %vm1566_vm0, %v1565_v0 }
 0x14b   :  { %v1795_v37 = vadd.f32 %v1182_v30, %v354_v35  ;;  %v1271_v38 = vpop.f32.mrb[7].mxu0  ;;  %1281 = vmatmul.mubr.msk.bf16.vlgmr.msra.gmra.mrb[8].mxu0 %vm390_vm2, %v383_v36  ;;  %v642_v51 = vpack.c.bf16 %v1792_v33, %v1792_v33 }
 0x14c   :  { %1292 = vmatprep.mubr.msk.bf16.mxu0 %vm1566_vm0, %v1565_v0 }
 0x14d   :  { %v1373_v39 = vpack.i.bf16 %v1795_v37, %v1792_v33  ;;  %v643_v52 = vpack.c.bf16 %v1795_v37, %v1795_v37  ;;  %v651_v55 = vsel %vm649_vm3, %v642_v51, 0 }
 0x14f   :  { %v697_v56 = vsel %vm649_vm3, %v643_v52, 0 }
 0x1b5   :  { %v1365_v41 = vpop.permute.xlu0 %1364 }
 0x1b6   :  { %v1367_v42 = vunpack.i.h.bf16 %v1365_v41  ;;  %v1366_v43 = vunpack.i.l.bf16 %v1365_v41 }
 0x1b8   :  { %v389_v44 = vpack.c.bf16 %v1367_v42, %v1367_v42  ;;  %v388_v45 = vpack.c.bf16 %v1366_v43, %v1366_v43 }
 0x1b9   :  { %v1370_v46 = vpop.permute.xlu0 %1369 }
 0x1ba   :  { %v487_v47 = vsel %vm390_vm2, %v388_v45, 0  ;;  %v533_v48 = vsel %vm390_vm2, %v389_v44, 0  ;;  %v1372_v49 = vunpack.i.h.bf16 %v1370_v46  ;;  %v1371_v50 = vunpack.i.l.bf16 %v1370_v46 }
 0x1bb   :  { %1285 = vmatpush3.bf16.xpose.msra.mxu1 %v487_v47  ;;  %1291 = vmatpush3.bf16.xpose.msra.mxu0 %v533_v48 }
 0x1bc   :  { %1296 = vmatprep.subr.bf16.mxu1 %v1565_v0  ;;  %1302 = vmatprep.subr.bf16.mxu0 %v1565_v0  ;;  %v385_v53 = vpack.c.bf16 %v1372_v49, %v1372_v49  ;;  %v384_v54 = vpack.c.bf16 %v1371_v50, %v1371_v50 }
 0x1c2   :  { %1287 = vmatmul.mubr.msk.bf16.vlgmr.msra.gmra.mrb[8].mxu1 %vm390_vm2, %v384_v54  ;;  %1293 = vmatmul.mubr.msk.bf16.vlgmr.msra.gmra.mrb[12].mxu0 %vm390_vm2, %v385_v53 }
 0x1c3   :  { %1297 = vmatpush3.bf16.msra.mxu1 %v651_v55  ;;  %1303 = vmatpush3.bf16.msra.mxu0 %v697_v56 }
 0x1c4   :  { %1298 = vmatprep.mubr.msk.bf16.mxu1 %vm1566_vm0, %v1565_v0  ;;  %1304 = vmatprep.mubr.msk.bf16.mxu0 %vm1566_vm0, %v1565_v0 }
 0x1c5   :  { %1308 = vmatprep.subr.bf16.mxu1 %v1565_v0  ;;  %1314 = vmatprep.subr.bf16.mxu0 %v1565_v0 }
 0x21c   :  { %v431_v8 = vpop.f32.mrb[4].mxu1 }
 0x21d   :  { %v589_v9 = vsel %vm587_vm8, -1e+09, %v431_v8  ;;  %v1276_v10 = vpop.f32.mrb[5].mxu1 }
 0x21e   :  { %v434_v11 = vpop.f32.mrb[6].mxu1  ;;  %v477_v12 = vpop.f32.mrb[8].mxu0  ;;  %v594_v13 = vsel %vm593_vm9, %v589_v9, -inf }
 0x21f   :  { %v590_v14 = vsel %vm588_vm10, -1e+09, %v477_v12  ;;  %595 = vmax.xlane.f32.xlu1 %v594_v13  ;;  %v1277_v15 = vpop.f32.mrb[7].mxu1  ;;  %v1282_v16 = vpop.f32.mrb[9].mxu0 }
 0x220   :  { %v480_v17 = vpop.f32.mrb[10].mxu0  ;;  %v597_v19 = vsel %vm593_vm9, %v590_v14, -inf }
 0x221   :  { %v1283_v18 = vpop.f32.mrb[11].mxu0 }
 0x222   :  { %v1396_v18 = vld [vmem:[#allocation9] sm:$0xff]  }
 0x223   :  { %598 = vmax.xlane.f32.xlu1 %v597_v19 }
 0x295   :  { %v523_v20 = vpop.f32.mrb[8].mxu1  ;;  %v569_v21 = vpop.f32.mrb[12].mxu0 }
 0x296   :  { %v591_v22 = vsel %vm587_vm8, -1e+09, %v523_v20  ;;  %v592_v23 = vsel %vm588_vm10, -1e+09, %v569_v21  ;;  %v1288_v24 = vpop.f32.mrb[9].mxu1  ;;  %v1294_v25 = vpop.f32.mrb[13].mxu0 }
 0x297   :  { %v526_v26 = vpop.f32.mrb[10].mxu1  ;;  %v572_v27 = vpop.f32.mrb[14].mxu0  ;;  %v600_v28 = vsel %vm593_vm9, %v591_v22, -inf  ;;  %v603_v29 = vsel %vm593_vm9, %v592_v23, -inf }
 0x298   :  { %601 = vmax.xlane.f32.xlu0 %v600_v28  ;;  %v1289_v30 = vpop.f32.mrb[11].mxu1  ;;  %604 = vmax.xlane.f32.xlu1 %v603_v29  ;;  %v1295_v31 = vpop.f32.mrb[15].mxu0  ;;  %v1397_v26 = vld [vmem:[#allocation9 + $0x8] sm:$0xff]  }
 0x2ac   :  { %v596_v32 = vpop.xlane.xlu1 %595 }
 0x2ad   :  { %v606_v34 = vsub.f32 %v589_v9, %v596_v32 }
 0x2af   :  { %v610_v35 = vmul.f32 1.442695, %v606_v34 }
 0x2b0   :  { %v599_v36 = vpop.xlane.xlu1 %598 }
 0x2b1   :  { %1404 = vpow2.f32 %v610_v35  ;;  %v607_v38 = vsub.f32 %v590_v14, %v599_v36 }
 0x2b3   :  { %v612_v40 = vmul.f32 1.442695, %v607_v38 }
 0x2b5   :  { %1406 = vpow2.f32 %v612_v40 }
 0x2bb   :  { %v1405_v41 = vpop.eup %1404 }
 0x2bc   :  { %v618_v42 = vsel %vm593_vm9, %v1405_v41, 0.0 }
 0x2bd   :  { %619 = vadd.xlane.f32.xlu1 %v618_v42 }
 0x2bf   :  { %v1407_v43 = vpop.eup %1406 }
 0x2c0   :  { %v621_v44 = vsel %vm593_vm9, %v1407_v43, 0.0 }
 0x2c1   :  { %622 = vadd.xlane.f32.xlu1 %v621_v44 }
 0x325   :  { %v602_v45 = vpop.xlane.xlu0 %601  ;;  %v605_v46 = vpop.xlane.xlu1 %604 }
 0x326   :  { %v608_v47 = vsub.f32 %v591_v22, %v602_v45  ;;  %v609_v48 = vsub.f32 %v592_v23, %v605_v46  ;;  %v1194_v45 = vld [vmem:[#allocation10] ss:$0 sm:$0xff] }
 0x328   :  { %v614_v49 = vmul.f32 1.442695, %v608_v47  ;;  %v616_v50 = vmul.f32 1.442695, %v609_v48 }
 0x32a   :  { %1408 = vpow2.f32 %v614_v49 }
 0x32b   :  { %1410 = vpow2.f32 %v616_v50 }
 0x334   :  { %v1409_v51 = vpop.eup %1408 }
 0x335   :  { %v624_v52 = vsel %vm593_vm9, %v1409_v51, 0.0  ;;  %v1411_v53 = vpop.eup %1410 }
 0x336   :  { %625 = vadd.xlane.f32.xlu1 %v624_v52  ;;  %v627_v54 = vsel %vm593_vm9, %v1411_v53, 0.0 }
 0x33a   :  { %628 = vadd.xlane.f32.xlu1 %v627_v54 }
 0x34a   :  { %v620_v55 = vpop.xlane.xlu1 %619 }
 0x34b   :  { %1412 = vrcp.f32 %v620_v55  ;;  %1374 = vrot.lane.b32.xlu1 %v1373_v39, %s1567_s5 }
 0x34e   :  { %v623_v56 = vpop.xlane.xlu1 %622 }
 0x34f   :  { %1414 = vrcp.f32 %v623_v56 }
 0x355   :  { %v1413_v57 = vpop.eup %1412 }
 0x356   :  { %v631_v58 = vmul.f32 %v1413_v57, %v1405_v41 }
 0x358   :  { %v638_v61 = vpack.c.bf16 %v631_v58, %v631_v58 }
 0x359   :  { %v1415_v63 = vpop.eup %1414 }
 0x35a   :  { %v633_v1 = vmul.f32 %v1415_v63, %v1407_v43  ;;  %1299 = vmatmul.mubr.msk.bf16.vlgmr.msra.gmra.mrb[12].mxu1 %vm593_vm9, %v638_v61 }
 0x35b   :  { %1310 = vmatprep.mubr.msk.bf16.mxu1 %vm1566_vm0, %v1565_v0 }
 0x35c   :  { %v639_v2 = vpack.c.bf16 %v633_v1, %v633_v1 }
 0x35e   :  { %1305 = vmatmul.mubr.msk.bf16.vlgmr.msra.gmra.mrb[16].mxu0 %vm593_vm9, %v639_v2 }
 0x35f   :  { %1316 = vmatprep.mubr.msk.bf16.mxu0 %vm1566_vm0, %v1565_v0 }
 0x3c3   :  { %v626_v33 = vpop.xlane.xlu1 %625 }
 0x3c4   :  { %1416 = vrcp.f32 %v626_v33 }
 0x3c7   :  { %v629_v37 = vpop.xlane.xlu1 %628 }
 0x3c8   :  { %1418 = vrcp.f32 %v629_v37 }
 0x3cb   :  { %v1375_v39 = vpop.permute.xlu1 %1374 }
 0x3cc   :  { %v1377_v3 = vunpack.i.h.bf16 %v1375_v39  ;;  %v1376_v6 = vunpack.i.l.bf16 %v1375_v39  ;;  %v1173_v39 = vsel %vm173_vm12, 1.0, %v1565_v0 }
 0x3ce   :  { %v1417_v7 = vpop.eup %1416  ;;  %v645_v8 = vpack.c.bf16 %v1377_v3, %v1377_v3  ;;  %v644_v9 = vpack.c.bf16 %v1376_v6, %v1376_v6  ;;  %v1398_v6 = vld [vmem:[%s1973_s12] sm:$0xff]  }
 0x3cf   :  { %v635_v10 = vmul.f32 %v1417_v7, %v1409_v51 }
 0x3d0   :  { %v743_v11 = vsel %vm649_vm3, %v644_v9, 0  ;;  %v789_v12 = vsel %vm649_vm3, %v645_v8, 0 }
 0x3d1   :  { %1309 = vmatpush3.bf16.msra.mxu1 %v743_v11  ;;  %1315 = vmatpush3.bf16.msra.mxu0 %v789_v12  ;;  %v640_v13 = vpack.c.bf16 %v635_v10, %v635_v10 }
 0x3d2   :  { %v1419_v14 = vpop.eup %1418  ;;  %1320 = vmatprep.subr.bf16.mxu1 %v1565_v0  ;;  %1328 = vmatprep.subr.bf16.mxu0 %v1565_v0 }
 0x3d3   :  { %v637_v15 = vmul.f32 %v1419_v14, %v1411_v53  ;;  %v1198_v14 = vld [vmem:[%s1971_s10] ss:$0 sm:$0xff] }
 0x3d4   :  { %1311 = vmatmul.mubr.msk.bf16.vlgmr.msra.gmra.mrb[16].mxu1 %vm593_vm9, %v640_v13 }
 0x3d5   :  { %v641_v16 = vpack.c.bf16 %v637_v15, %v637_v15  ;;  %1324 = vmatprep.mubr.msk.bf16.mxu1 %vm1566_vm0, %v1565_v0  ;;  %1321 = vmatpush3.bf16.msra.mxu1 %v1396_v18  ;;  %v1199_v18 = vld [vmem:[%s1990_s0] ss:$0 sm:$0xff] }
 0x3d6   :  { %1322 = vmatprep.subr.bf16.mxu1 %v1565_v0 }
 0x3d7   :  { %1317 = vmatmul.mubr.msk.bf16.vlgmr.msra.gmra.mrb[20].mxu0 %vm593_vm9, %v641_v16 }
 0x3d8   :  { %1332 = vmatprep.mubr.msk.bf16.mxu0 %vm1566_vm0, %v1565_v0  ;;  %1329 = vmatpush3.bf16.msra.mxu0 %v1398_v6 }
 0x3d9   :  { %1323 = vmatpush3.bf16.msra.mxu1 %v1397_v26  ;;  %1330 = vmatprep.subr.bf16.mxu0 %v1565_v0 }
 0x3da   :  { %1336 = vmatprep.subr.bf16.mxu1 %v1565_v0 }
 0x3dc   :  { %1331 = vmatpush3.bf16.msra.mxu0 %v1399_v59 }
 0x42d   :  { %v687_v17 = vpop.f32.mrb[12].mxu1 }
 0x42e   :  { %v1300_v19 = vpop.f32.mrb[13].mxu1 }
 0x42f   :  { %v690_v20 = vpop.f32.mrb[14].mxu1 }
 0x430   :  { %v1301_v21 = vpop.f32.mrb[15].mxu1 }
 0x431   :  { %v733_v22 = vpop.f32.mrb[16].mxu0 }
 0x432   :  { %v1306_v23 = vpop.f32.mrb[17].mxu0 }
 0x433   :  { %v736_v24 = vpop.f32.mrb[18].mxu0 }
 0x434   :  { %v1307_v25 = vpop.f32.mrb[19].mxu0 }
 0x4a7   :  { %v779_v27 = vpop.f32.mrb[16].mxu1 }
 0x4a8   :  { %v1312_v28 = vpop.f32.mrb[17].mxu1 }
 0x4a9   :  { %v782_v29 = vpop.f32.mrb[18].mxu1 }
 0x4aa   :  { %v1313_v30 = vpop.f32.mrb[19].mxu1  ;;  %v825_v31 = vpop.f32.mrb[20].mxu0  ;;  %v1402_v29 = vld [vmem:[%s1975_s14 + $0x10] sm:$0xff]  }
 0x4ab   :  { %v1378_v32 = vpack.i.bf16 %v825_v31, %v779_v27  ;;  %v1318_v34 = vpop.f32.mrb[21].mxu0  ;;  %v1403_v30 = vld [vmem:[%s1975_s14 + $0x18] sm:$0xff]   ;;  %v1200_v31 = vld [vmem:[%s1974_s13] ss:$0 sm:$0xff] }
 0x4ac   :  { %v828_v35 = vpop.f32.mrb[22].mxu0 }
 0x4ad   :  { %1379 = vrot.lane.b32.xlu0 %v1378_v32, %s1569_s8  ;;  %v1319_v36 = vpop.f32.mrb[23].mxu0 }
 0x51f   :  { %v1380_v38 = vpop.permute.xlu0 %1379 }
 0x520   :  { %v1382_v40 = vunpack.i.h.bf16 %v1380_v38  ;;  %v1381_v41 = vunpack.i.l.bf16 %v1380_v38 }
 0x522   :  { %v840_v42 = vsel %vm390_vm2, %v733_v22, %v1382_v40  ;;  %v839_v43 = vsel %vm390_vm2, %v687_v17, %v1381_v41 }
 0x523   :  { %v841_v44 = vpack.c.bf16 %v840_v42, %v839_v43 }
 0x525   :  { %1325 = vmatmul.mubr.msk.bf16.vlgmr.msra.gmra.mrb[20].mxu1 %vm195_vm1, %v841_v44 }
 0x526   :  { %1344 = vmatprep.mubr.msk.bf16.mxu1 %vm1566_vm0, %v1565_v0  ;;  %1337 = vmatpush3.bf16.msra.mxu1 %v1400_v60  ;;  %v1210_v60 = vld [vmem:[%s1977_s16] ss:$0 sm:$0xff]  ;;  %s1526_s16 = scalar_lea.vmem %s1156_s26, 256 }
 0x527   :  { %1338 = vmatprep.subr.bf16.mxu1 %v1565_v0  ;;  %p1527_p7 = scmp.ne.s32.totalorder %s1156_s26, %s1526_s16  ;;  %p1532_p9 = scmp.lt.s32.totalorder %s1526_s16, %s1526_s16 }
 0x529   :  { %p1533_p10 = por %p1532_p9, %p1531_p8 }
 0x52a   :  { %1339 = vmatpush3.bf16.msra.mxu1 %v1401_v62 }
 0x52b   :  { %1340 = vmatprep.subr.bf16.mxu1 %v1565_v0  ;;  %p1534_p11 = pnand %p1533_p10, %p1527_p7 }
 0x52e   :  { %1341 = vmatpush3.bf16.msra.mxu1 %v1402_v29 }
 0x52f   :  { %1342 = vmatprep.subr.bf16.mxu1 %v1565_v0 }
 0x532   :  { %1343 = vmatpush3.bf16.msra.mxu1 %v1403_v30 }
 0x5f8   :  { %v897_v46 = vpop.f32.mrb[20].mxu1 }
 0x5f9   :  { %v898_v47 = vadd.f32 %v1194_v45, %v897_v46  ;;  %v1326_v48 = vpop.f32.mrb[21].mxu1 }
 0x5fa   :  { %v900_v49 = vpop.f32.mrb[22].mxu1 }
 0x5fb   :  { %v901_v50 = vadd.f32 %v1194_v45, %v900_v49  ;;  %v1327_v51 = vpop.f32.mrb[23].mxu1  ;;  %v904_v52 = vadd.f32 %v898_v47, %v1754_v4 }
 0x5fd   :  { %v906_v53 = vsel %vm195_vm1, %v904_v52, 0.0  ;;  %v905_v54 = vadd.f32 %v901_v50, %v1759_v5  ;;  %v1170_v5 = vsel %vm164_vm11, 1.0, %v1565_v0  ;;  %v1204_v0 = vld [vmem:[%s1976_s15] ss:$0 sm:$0xff] }
 0x5fe   :  { %907 = vadd.xlane.f32.xlu1 %v906_v53  ;;  %v1384_v3 = vpack.i.bf16 %v1173_v39, %v1170_v5 }
 0x5ff   :  { %v909_v55 = vsel %vm195_vm1, %v905_v54, 0.0 }
 0x600   :  { %910 = vadd.xlane.f32.xlu0 %v909_v55 }
 0x68b   :  { %v908_v56 = vpop.xlane.xlu1 %907 }
 0x68c   :  { %v913_v57 = vmul.f32 0.03125, %v908_v56 }
 0x68d   :  { %v911_v58 = vpop.xlane.xlu0 %910 }
 0x68e   :  { %v915_v61 = vsub.f32 %v904_v52, %v913_v57  ;;  %v914_v63 = vmul.f32 0.03125, %v911_v58 }
 0x690   :  { %v916_v1 = vsub.f32 %v905_v54, %v914_v63  ;;  %v917_v2 = vmul.f32 %v915_v61, %v915_v61 }
 0x692   :  { %v919_v33 = vsel %vm195_vm1, %v917_v2, 0.0  ;;  %v918_v4 = vmul.f32 %v916_v1, %v916_v1 }
 0x693   :  { %920 = vadd.xlane.f32.xlu1 %v919_v33 }
 0x694   :  { %v922_v37 = vsel %vm195_vm1, %v918_v4, 0.0 }
 0x697   :  { %923 = vadd.xlane.f32.xlu1 %v922_v37 }
 0x6a8   :  { %1385 = vperm.xlu1 %1383, %v1384_v3  }
 0x720   :  { %v921_v7 = vpop.xlane.xlu1 %920 }
 0x721   :  { %v925_v8 = vmul.f32 0.03125, %v921_v7  ;;  %v1211_v7 = vld [vmem:[%s1978_s17] ss:$0 sm:$0xff] }
 0x723   :  { %v927_v9 = vadd.f32 1e-05, %v925_v8 }
 0x724   :  { %v924_v10 = vpop.xlane.xlu1 %923 }
 0x725   :  { %1420 = vrsqrt.f32 %v927_v9  ;;  %v926_v11 = vmul.f32 0.03125, %v924_v10 }
 0x727   :  { %v928_v12 = vadd.f32 1e-05, %v926_v11 }
 0x728   :  { %v1911_v19 = vpop.permute.xlu1 %1385 }
 0x729   :  { %1422 = vrsqrt.f32 %v928_v12  ;;  %v1388_v23 = vunpack.i.h.bf16 %v1911_v19  ;;  %v1387_v24 = vunpack.i.l.bf16 %v1911_v19 }
 0x72f   :  { %v1421_v13 = vpop.eup %1420 }
 0x730   :  { %v931_v15 = vmul.f32 %v1421_v13, %v915_v61 }
 0x732   :  { %v939_v16 = vmul.f32 %v1198_v14, %v931_v15 }
 0x733   :  { %v1423_v17 = vpop.eup %1422 }
 0x734   :  { %v932_v20 = vmul.f32 %v1423_v17, %v916_v1  ;;  %v947_v22 = vadd.f32 %v1199_v18, %v939_v16 }
 0x736   :  { %v940_v21 = vmul.f32 %v1198_v14, %v932_v20  ;;  %v959_v27 = vmul.f32 %v1387_v24, %v947_v22 }
 0x738   :  { %v948_v25 = vadd.f32 %v1199_v18, %v940_v21 }
 0x73a   :  { %v960_v26 = vmul.f32 %v1388_v23, %v948_v25 }
 0x73c   :  { %v961_v28 = vpack.c.bf16 %v960_v26, %v959_v27 }
 0x73e   :  { %1333 = vmatmul.mubr.msk.bf16.vlgmr.msra.gmra.mrb[24].mxu0 %vm195_vm1, %v961_v28 }
 0x811   :  { %v1017_v32 = vpop.f32.mrb[24].mxu0 }
 0x812   :  { %v1018_v34 = vadd.f32 %v1200_v31, %v1017_v32  ;;  %v1334_v35 = vpop.f32.mrb[25].mxu0 }
 0x813   :  { %v1020_v36 = vpop.f32.mrb[26].mxu0 }
 0x814   :  { %v1021_v38 = vadd.f32 %v1200_v31, %v1020_v36  ;;  %v1335_v40 = vpop.f32.mrb[27].mxu0  ;;  %v1024_v41 = vmax.f32 %v1018_v34, 0.0 }
 0x816   :  { %v1025_v42 = vmax.f32 %v1021_v38, 0.0 }
 0x818   :  { %v1026_v43 = vpack.c.bf16 %v1025_v42, %v1024_v41 }
 0x81a   :  { %1345 = vmatmul.mubr.msk.bf16.vlgmr.msra.gmra.mrb[24].mxu1 %vm1057_vm13, %v1026_v43 }
 0x8ed   :  { %v1095_v44 = vpop.f32.mrb[24].mxu1 }
 0x8ee   :  { %v1096_v45 = vadd.f32 %v1204_v0, %v1095_v44  ;;  %v1346_v46 = vpop.f32.mrb[25].mxu1 }
 0x8ef   :  { %v1098_v47 = vpop.f32.mrb[26].mxu1 }
 0x8f0   :  { %v1099_v48 = vadd.f32 %v1204_v0, %v1098_v47  ;;  %v1347_v49 = vpop.f32.mrb[27].mxu1  ;;  %v1102_v50 = vadd.f32 %v1096_v45, %v959_v27 }
 0x8f2   :  { %v1104_v51 = vsel %vm195_vm1, %v1102_v50, 0.0  ;;  %v1103_v52 = vadd.f32 %v1099_v48, %v960_v26 }
 0x8f3   :  { %1105 = vadd.xlane.f32.xlu0 %v1104_v51 }
 0x8f4   :  { %v1107_v53 = vsel %vm195_vm1, %v1103_v52, 0.0 }
 0x8f7   :  { %1108 = vadd.xlane.f32.xlu0 %v1107_v53 }
 0x980   :  { %v1106_v54 = vpop.xlane.xlu0 %1105 }
 0x981   :  { %v1110_v55 = vmul.f32 0.03125, %v1106_v54 }
 0x983   :  { %v1112_v56 = vsub.f32 %v1102_v50, %v1110_v55 }
 0x984   :  { %v1109_v57 = vpop.xlane.xlu0 %1108 }
 0x985   :  { %v1111_v58 = vmul.f32 0.03125, %v1109_v57  ;;  %v1114_v61 = vmul.f32 %v1112_v56, %v1112_v56 }
 0x987   :  { %v1113_v63 = vsub.f32 %v1103_v52, %v1111_v58  ;;  %v1116_v1 = vsel %vm195_vm1, %v1114_v61, 0.0 }
 0x988   :  { %1117 = vadd.xlane.f32.xlu0 %v1116_v1 }
 0x989   :  { %v1115_v2 = vmul.f32 %v1113_v63, %v1113_v63 }
 0x98b   :  { %v1119_v33 = vsel %vm195_vm1, %v1115_v2, 0.0 }
 0x98c   :  { %1120 = vadd.xlane.f32.xlu0 %v1119_v33 }
 0xa15   :  { %v1118_v4 = vpop.xlane.xlu0 %1117 }
 0xa16   :  { %v1122_v37 = vmul.f32 0.03125, %v1118_v4 }
 0xa18   :  { %v1124_v5 = vadd.f32 1e-05, %v1122_v37 }
 0xa19   :  { %v1121_v39 = vpop.xlane.xlu0 %1120 }
 0xa1a   :  { %1424 = vrsqrt.f32 %v1124_v5  ;;  %v1123_v3 = vmul.f32 0.03125, %v1121_v39 }
 0xa1c   :  { %v1125_v6 = vadd.f32 1e-05, %v1123_v3 }
 0xa1e   :  { %1426 = vrsqrt.f32 %v1125_v6 }
 0xa24   :  { %v1425_v59 = vpop.eup %1424 }
 0xa25   :  { %v1128_v62 = vmul.f32 %v1425_v59, %v1112_v56 }
 0xa27   :  { %v1136_v8 = vmul.f32 %v1210_v60, %v1128_v62 }
 0xa28   :  { %v1427_v9 = vpop.eup %1426 }
 0xa29   :  { %v1129_v10 = vmul.f32 %v1427_v9, %v1113_v63  ;;  %v1144_v11 = vadd.f32 %v1211_v7, %v1136_v8 }
 0xa2b   :  { %v1137_v12 = vmul.f32 %v1210_v60, %v1129_v10  ;;  %v1146_v13 = vmul.f32 %v1387_v24, %v1144_v11 }
 0xa2d   :  { %v1145_v14 = vadd.f32 %v1211_v7, %v1137_v12  ;;  %1148 = vst.msk [vmem:[#allocation12] sm:$0xff] %vm195_vm1, %v1146_v13 }
 0xa2f   :  { %v1147_v15 = vmul.f32 %v1388_v23, %v1145_v14 }
 0xa31   :  { %1149 = vst.msk [vmem:[#allocation12 + $0x8] sm:$0xff] %vm195_vm1, %v1147_v15 }
 0xa32   :  { %1537 = shalt.err (!%p1534_p11)
}
 0xa33   :  { %s1538_s7 = scalar_lea.hbm %s1979_s18, 256 }
 0xa34   :  { %p1539_p12 = scmp.ne.s32.totalorder %s1979_s18, %s1538_s7  ;;  %p1542_p13 = scmp.lt.u32.totalorder %s1538_s7, %s1979_s18 }
 0xa36   :  { %p1544_p0 = pnand %p1542_p13, %p1539_p12 }
 0xa38   :  { %1547 = shalt.err (!%p1544_p0)
}
 0xa39   :  { %s1571_s27 = smov 128   ;;  %s1572_s28 = smov 8  }
 0xa3a   :  { %1161 = dma.vmem_to_hbm [thread:$0]  %s1156_s26, 256, %s1979_s18, [#allocation6], %s1571_s27, %s1571_s27, %s1572_s28  }
 0xa3b   :  { %1556 = dma.done.wait [#allocation6], 256  }
 0xa3c   :  { %1557 = vsyncadd [#allocation6], 4294967040 }
 0xa3d   :  { %1165 = vsyncpa [#allocation5], 1 }
 0xa3e   :  { %1166 = vsyncpa [#allocation8], 1 }
 0xa3f   :  { %1167 = vsyncpa [#allocation11], 1 }
 0xa40   :  { %1168 = vsyncpa [#allocation6], 1 }

</bundles_post_ra>
